<compile_context>
chip_gen: v7x
topology: tpu7x:2x2x1
jax: 0.10.0
libtpu: 0.0.40
codegen_flags: <defaults>
</compile_context>

<pallas_src>
import jax
import jax.numpy as jnp
from jax import lax
from jax.experimental import pallas as pl
from jax.experimental.pallas import tpu as pltpu


def _round_up(a, b):
    return ((a + b - 1) // b) * b


def _largest_aligned_divisor(total, cap, align=128):
    """Largest multiple of `align` that divides `total` (itself a multiple of
    `align`) and is <= cap.  Avoids over-padding the lane / reduction dims."""
    best = align
    t = align
    while t <= min(total, cap):
        if total % t == 0:
            best = t
        t += align
    return best


# ---------------------------------------------------------------------------
# kernels
# ---------------------------------------------------------------------------
def _patch_embed_kernel(x_ref, w_ref, b_ref, o_ref):
    """Collapsed-K path: one MXU matmul + bias; no accumulator, no branches."""
    o_ref[...] = (
        jnp.dot(x_ref[...], w_ref[...], preferred_element_type=jnp.float32)
        + b_ref[...]
    ).astype(o_ref.dtype)


def _patch_embed_kernel_kred(x_ref, w_ref, b_ref, o_ref):
    """Large-K path: K grid-tiled; accumulate directly into the resident f32
    output tile (no VMEM scratch); bias folded into the k == 0 init."""
    k = pl.program_id(2)

    @pl.when(k == 0)
    def _():
        o_ref[...] = jnp.broadcast_to(b_ref[...], o_ref.shape)

    o_ref[...] += jnp.dot(
        x_ref[...], w_ref[...], preferred_element_type=jnp.float32
    )


# ---------------------------------------------------------------------------
# wrapper
# ---------------------------------------------------------------------------
_TM_MAX = 512            # row tile (M axis)
_TE_MAX = 1024           # lane tile (E axis) -- covers all of E for E <= 1024
_TK_MAX = 2048           # reduction tile when K must be grid-tiled
_K_COLLAPSE_MAX = 2048   # keep the whole reduction in one block up to this K
_VMEM_LIMIT = 32 * 1024 * 1024  # explicit scoped-VMEM limit (safe v5e/v6e/v7x)


def _point_reducer_impl(x, weight, bias, patch_size, core_parallel):
    """x: [B, C, H, W, D]; weight: [E, C, p, p, p]; bias: [E]
    -> [B, E, H/p, W/p, D/p]   (Conv3d with kernel=stride=p, padding=0)."""
    B, C, H, W, D = x.shape
    p = patch_size
    E = weight.shape[0]
    nH, nW, nD = H // p, W // p, D // p
    M = B * nH * nW * nD
    K = C * p * p * p
    out_dtype = x.dtype
    # bf16 inputs halve HBM traffic for the dominant (M,K) stream; f32 accum.
    # NOTE: documented precision deviation vs the f32 PyTorch Conv3d reference.
    compute_dtype = jnp.bfloat16

    # ---- glue: im2col patch extraction (one fused XLA pass: cast+reshape+T) -
    # TODO(synk): fuse im2col into the kernel (per-(C,p,p,p) window blocks +
    # in-kernel einshape) to avoid materializing the (M,K) patches matrix once.
    patches = x.astype(compute_dtype).reshape(B, C, nH, p, nW, p, nD, p)
    patches = patches.transpose(0, 2, 4, 6, 1, 3, 5, 7).reshape(M, K)

    # weight flattened in the same (C, kh, kw, kd) order, transposed to [K, E]
    w_mat = weight.astype(compute_dtype).reshape(E, K).T
    b_mat = bias.astype(jnp.float32).reshape(1, E)

    # ---- tile sizes ---------------------------------------------------------
    TM = _TM_MAX if M >= _TM_MAX else _round_up(M, 8)
    M_pad = _round_up(M, TM)
    E_pad = _round_up(E, 128)                        # lane-dense output stores
    TE = _largest_aligned_divisor(E_pad, _TE_MAX)    # == E_pad for E <= 1024

    collapse_k = K <= _K_COLLAPSE_MAX
    if collapse_k:
        K_pad, TK = K, K                             # full-extent K: no padding
    else:
        K_pad = _round_up(K, 128)                    # minimal 128 alignment
        TK = _largest_aligned_divisor(K_pad, _TK_MAX)  # divides K_pad exactly

    if (M_pad, K_pad) != (M, K):
        patches = jnp.pad(patches, ((0, M_pad - M), (0, K_pad - K)))
    if (K_pad, E_pad) != (K, E):
        w_mat = jnp.pad(w_mat, ((0, K_pad - K), (0, E_pad - E)))
    if E_pad != E:
        b_mat = jnp.pad(b_mat, ((0, 0), (0, E_pad - E)))

    grid_m, grid_e, grid_k = M_pad // TM, E_pad // TE, K_pad // TK

    # Split the M axis across both TensorCores on megacore parts (v7x); plain
    # PARALLEL elsewhere / when there is only one M tile.
    m_sem = (pltpu.CORE_PARALLEL
             if (core_parallel and grid_m > 1) else pltpu.PARALLEL)

    if collapse_k:
        out = pl.pallas_call(
            _patch_embed_kernel,
            out_shape=jax.ShapeDtypeStruct((M_pad, E_pad), out_dtype),
            grid_spec=pltpu.PrefetchScalarGridSpec(
                num_scalar_prefetch=0,
                grid=(grid_m, grid_e),
                in_specs=[
                    pl.BlockSpec((TM, K_pad), lambda i, j: (i, 0)),
                    pl.BlockSpec((K_pad, TE), lambda i, j: (0, j)),
                    pl.BlockSpec((1, TE), lambda i, j: (0, j)),
                ],
                out_specs=pl.BlockSpec((TM, TE), lambda i, j: (i, j)),
            ),
            compiler_params=pltpu.CompilerParams(
                dimension_semantics=(m_sem, pltpu.ARBITRARY),
                vmem_limit_bytes=_VMEM_LIMIT),
        )(patches, w_mat, b_mat)
    else:
        out = pl.pallas_call(
            _patch_embed_kernel_kred,
            out_shape=jax.ShapeDtypeStruct((M_pad, E_pad), jnp.float32),
            grid_spec=pltpu.PrefetchScalarGridSpec(
                num_scalar_prefetch=0,
                grid=(grid_m, grid_e, grid_k),
                in_specs=[
                    pl.BlockSpec((TM, TK), lambda i, j, k: (i, k)),
                    pl.BlockSpec((TK, TE), lambda i, j, k: (k, j)),
                    pl.BlockSpec((1, TE), lambda i, j, k: (0, j)),
                ],
                out_specs=pl.BlockSpec((TM, TE), lambda i, j, k: (i, j)),
            ),
            compiler_params=pltpu.CompilerParams(
                # K stays innermost and unsplit per (i,j) tile so the
                # accumulate-into-output pattern remains valid.
                dimension_semantics=(m_sem, pltpu.ARBITRARY, pltpu.ARBITRARY),
                vmem_limit_bytes=_VMEM_LIMIT),
        )(patches, w_mat, b_mat)

    # ---- epilogue: drop padding, back to channels-first [B, E, nH, nW, nD] --
    # TODO(synk): the module requires channels-first output; this transpose is
    # one XLA pass over the (small) output (could be folded in-kernel with an
    # XLU transpose + 5-D out_spec if a channels-last consumer were allowed).
    out = out[:M, :E].reshape(B, nH, nW, nD, E)
    out = out.transpose(0, 4, 1, 2, 3).astype(out_dtype)
    return out


_point_reducer_jit = jax.jit(
    _point_reducer_impl, static_argnames=("patch_size", "core_parallel"))


def point_reducer_forward(x, weight, bias, patch_size):
    try:
        return _point_reducer_jit(
            x, weight, bias, patch_size=patch_size, core_parallel=True)
    except Exception:
        # Fallback for TPU generations / toolchains that reject CORE_PARALLEL.
        return _point_reducer_jit(
            x, weight, bias, patch_size=patch_size, core_parallel=False)


if __name__ == "__main__":
    # Small shapes consistent with the module (patch_size == stride, padding=0).
    B, C, H, W, D = 2, 5, 8, 8, 8
    patch_size = 4
    embed_dim = 32

    key = jax.random.PRNGKey(0)
    kx, kw, kb = jax.random.split(key, 3)
    x = jax.random.normal(kx, (B, C, H, W, D), dtype=jnp.float32)
    weight = 0.05 * jax.random.normal(
        kw, (embed_dim, C, patch_size, patch_size, patch_size), dtype=jnp.float32)
    bias = 0.05 * jax.random.normal(kb, (embed_dim,), dtype=jnp.float32)

    out = point_reducer_forward(x, weight, bias, patch_size)
    out = jax.block_until_ready(out)
    assert out.shape == (B, embed_dim, H // patch_size, W // patch_size, D // patch_size)

    # Reference check against XLA's Conv3d (NCDHW / OIDHW), strided, no padding.
    # Tolerance loosened because the kernel computes in bf16 (f32 accumulation).
    ref = lax.conv_general_dilated(
        x, weight,
        window_strides=(patch_size, patch_size, patch_size),
        padding="VALID",
        dimension_numbers=("NCDHW", "OIDHW", "NCDHW"),
    ) + bias.reshape(1, embed_dim, 1, 1, 1)
    if not jnp.allclose(out, ref, atol=5e-2, rtol=5e-2):
        raise AssertionError("Pallas output does not match Conv3d reference")

    print("KERNEL_OK")
</pallas_src>

<mosaic_0001>
module attributes {stable_mosaic.version = 11 : i64} {
  func.func @_patch_embed_kernel(%arg0: i32, %arg1: i32, %arg2: memref<16x320xbf16, #tpu.memory_space<vmem>>, %arg3: memref<320x128xbf16, #tpu.memory_space<vmem>>, %arg4: memref<1x128xf32, #tpu.memory_space<vmem>>, %arg5: memref<16x128xf32, #tpu.memory_space<vmem>>) attributes {dimension_semantics = [#tpu.dimension_semantics<parallel>, #tpu.dimension_semantics<arbitrary>], iteration_bounds = array<i64: 1, 1>, scalar_prefetch = 0 : i64, scratch_operands = 0 : i64, tpu.core_type = #tpu.core_type<tc>, window_params = [{transform_indices = @transform_0, window_bounds = array<i64: 16, 320>}, {transform_indices = @transform_1, window_bounds = array<i64: 320, 128>}, {transform_indices = @transform_2, window_bounds = array<i64: 1, 128>}, {transform_indices = @transform_3, window_bounds = array<i64: 16, 128>}]} {
    %c0 = arith.constant 0 : index
    %c0_0 = arith.constant 0 : index
    %0 = vector.load %arg2[%c0, %c0_0] : memref<16x320xbf16, #tpu.memory_space<vmem>>, vector<16x320xbf16>
    %c0_1 = arith.constant 0 : index
    %c0_2 = arith.constant 0 : index
    %1 = vector.load %arg3[%c0_1, %c0_2] : memref<320x128xbf16, #tpu.memory_space<vmem>>, vector<320x128xbf16>
    %cst = arith.constant dense<0.000000e+00> : vector<16x128xf32>
    %2 = tpu.matmul %0, %1, %cst {dimension_numbers = #tpu.dot_dimension_numbers<[1], [0], [0], [1], [0, 0, 1, 1], [], []>} : vector<16x320xbf16>, vector<320x128xbf16>, vector<16x128xf32> -> vector<16x128xf32>
    %c0_3 = arith.constant 0 : index
    %c0_4 = arith.constant 0 : index
    %3 = vector.load %arg4[%c0_3, %c0_4] : memref<1x128xf32, #tpu.memory_space<vmem>>, vector<1x128xf32>
    %4 = vector.broadcast %3 : vector<1x128xf32> to vector<16x128xf32>
    %5 = arith.addf %2, %4 : vector<16x128xf32>
    %c0_5 = arith.constant 0 : index
    %c0_6 = arith.constant 0 : index
    %6 = vector.load %arg5[%c0_5, %c0_6] : memref<16x128xf32, #tpu.memory_space<vmem>>, vector<16x128xf32>
    tpu.vector_store %arg5[%c0_5, %c0_6], %5 {strides = array<i32>} : memref<16x128xf32, #tpu.memory_space<vmem>>, vector<16x128xf32>,
    return
  }
  func.func @transform_0(%arg0: i32, %arg1: i32) -> (i32, i32) {
    %c0_i32 = arith.constant 0 : i32
    %c0_i32_0 = arith.constant 0 : i32
    return %arg0, %c0_i32 : i32, i32
  }
  func.func @transform_1(%arg0: i32, %arg1: i32) -> (i32, i32) {
    %c0_i32 = arith.constant 0 : i32
    %c0_i32_0 = arith.constant 0 : i32
    return %c0_i32, %arg1 : i32, i32
  }
  func.func @transform_2(%arg0: i32, %arg1: i32) -> (i32, i32) {
    %c0_i32 = arith.constant 0 : i32
    %c0_i32_0 = arith.constant 0 : i32
    return %c0_i32, %arg1 : i32, i32
  }
  func.func @transform_3(%arg0: i32, %arg1: i32) -> (i32, i32) {
    %c0_i32 = arith.constant 0 : i32
    return %arg0, %arg1 : i32, i32
  }
}

module attributes {stable_mosaic.version = 11 : i64} {
  func.func @_patch_embed_kernel(%arg0: i32, %arg1: i32, %arg2: memref<16x320xbf16, #tpu.memory_space<vmem>>, %arg3: memref<320x128xbf16, #tpu.memory_space<vmem>>, %arg4: memref<1x128xf32, #tpu.memory_space<vmem>>, %arg5: memref<16x128xf32, #tpu.memory_space<vmem>>) attributes {dimension_semantics = [#tpu.dimension_semantics<parallel>, #tpu.dimension_semantics<arbitrary>], iteration_bounds = array<i64: 1, 1>, scalar_prefetch = 0 : i64, scratch_operands = 0 : i64, tpu.core_type = #tpu.core_type<tc>, window_params = [{transform_indices = @transform_0, window_bounds = array<i64: 16, 320>}, {transform_indices = @transform_1, window_bounds = array<i64: 320, 128>}, {transform_indices = @transform_2, window_bounds = array<i64: 1, 128>}, {transform_indices = @transform_3, window_bounds = array<i64: 16, 128>}]} {
    %c0 = arith.constant 0 : index
    %c0_0 = arith.constant 0 : index
    %0 = vector.load %arg2[%c0, %c0_0] : memref<16x320xbf16, #tpu.memory_space<vmem>>, vector<16x320xbf16>
    %c0_1 = arith.constant 0 : index
    %c0_2 = arith.constant 0 : index
    %1 = vector.load %arg3[%c0_1, %c0_2] : memref<320x128xbf16, #tpu.memory_space<vmem>>, vector<320x128xbf16>
    %cst = arith.constant dense<0.000000e+00> : vector<16x128xf32>
    %2 = tpu.matmul %0, %1, %cst {dimension_numbers = #tpu.dot_dimension_numbers<[1], [0], [0], [1], [0, 0, 1, 1], [], []>} : vector<16x320xbf16>, vector<320x128xbf16>, vector<16x128xf32> -> vector<16x128xf32>
    %c0_3 = arith.constant 0 : index
    %c0_4 = arith.constant 0 : index
    %3 = vector.load %arg4[%c0_3, %c0_4] : memref<1x128xf32, #tpu.memory_space<vmem>>, vector<1x128xf32>
    %4 = vector.broadcast %3 : vector<1x128xf32> to vector<16x128xf32>
    %5 = arith.addf %2, %4 : vector<16x128xf32>
    %c0_5 = arith.constant 0 : index
    %c0_6 = arith.constant 0 : index
    %6 = vector.load %arg5[%c0_5, %c0_6] : memref<16x128xf32, #tpu.memory_space<vmem>>, vector<16x128xf32>
    tpu.vector_store %arg5[%c0_5, %c0_6], %5 {strides = array<i32>} : memref<16x128xf32, #tpu.memory_space<vmem>>, vector<16x128xf32>,
    return
  }
  func.func @transform_0(%arg0: i32, %arg1: i32) -> (i32, i32) {
    %c0_i32 = arith.constant 0 : i32
    %c0_i32_0 = arith.constant 0 : i32
    return %arg0, %c0_i32 : i32, i32
  }
  func.func @transform_1(%arg0: i32, %arg1: i32) -> (i32, i32) {
    %c0_i32 = arith.constant 0 : i32
    %c0_i32_0 = arith.constant 0 : i32
    return %c0_i32, %arg1 : i32, i32
  }
  func.func @transform_2(%arg0: i32, %arg1: i32) -> (i32, i32) {
    %c0_i32 = arith.constant 0 : i32
    %c0_i32_0 = arith.constant 0 : i32
    return %c0_i32, %arg1 : i32, i32
  }
  func.func @transform_3(%arg0: i32, %arg1: i32) -> (i32, i32) {
    %c0_i32 = arith.constant 0 : i32
    return %arg0, %arg1 : i32, i32
  }
}

</mosaic_0001>

<bundles_post_ra>
// kernel: _point_reducer_impl.1
= control target key start
LH: loop header
LB: loop body
LE: loop exit
PB: predicated region body
PF: predicated region fallthrough
CT: control target
= control target key end

     0   :  { %v423_v2 = vmov 0.0   ;;  %vm424_vm0 = vmmov 0   ;;  %s532_s0 = inlined_call_operand.vmem [shape: bf16[16,320], index: 0, kind: input, shape index: {}]   ;;  %s533_s1 = inlined_call_operand.vmem [shape: bf16[320,128], index: 1, kind: input, shape index: {}]   ;;  %s534_s2 = inlined_call_operand.vmem [shape: f32[1,128], index: 2, kind: input, shape index: {}]   ;;  %s535_s3 = inlined_call_operand.hbm [shape: f32[16,128], index: 3, kind: output, shape index: {}]  }
   0x1   :  { %v375_v0 = vld [vmem:[%s533_s1 + $0x40] sm:$0xff]   ;;  %358 = vmatprep.subr.bf16.mxu1 %v423_v2  ;;  %v377_v3 = vld [vmem:[%s533_s1 + $0x48] sm:$0xff]   ;;  %366 = vmatprep.mubr.msk.bf16.mxu1 %vm424_vm0, %v423_v2  ;;  %v379_v5 = vld [vmem:[%s533_s1 + $0x50] sm:$0xff]  }
   0x2   :  { %v376_v1 = vld [vmem:[%s533_s1] sm:$0xff]   ;;  %331 = vmatprep.subr.bf16.mxu0 %v375_v0  ;;  %v378_v4 = vld [vmem:[%s533_s1 + $0x8] sm:$0xff]   ;;  %v380_v6 = vld [vmem:[%s533_s1 + $0x10] sm:$0xff]  }
   0x3   :  { %332 = vmatpush3.bf16.msra.mxu0 %v376_v1  ;;  %v381_v7 = vld [vmem:[%s533_s1 + $0x58] sm:$0xff]   ;;  %v385_v8 = vld [vmem:[%s533_s1 + $0x80] sm:$0xff]   ;;  %v388_v11 = vld [vmem:[%s533_s1 + $0x88] sm:$0xff]  }
   0x4   :  { %333 = vmatprep.subr.bf16.mxu0 %v377_v3  ;;  %v382_v9 = vld [vmem:[%s533_s1 + $0x18] sm:$0xff]   ;;  %v383_v10 = vld [vmem:[%s533_s1 + $0x60] sm:$0xff]   ;;  %359 = vmatpush3.bf16.msra.mxu1 %v385_v8  ;;  %v386_v13 = vld [vmem:[%s533_s1 + $0x68] sm:$0xff]  }
   0x5   :  { %360 = vmatprep.subr.bf16.mxu1 %v423_v2  ;;  %v384_v12 = vld [vmem:[%s533_s1 + $0x20] sm:$0xff]   ;;  %v391_v14 = vld [vmem:[%s533_s1 + $0x90] sm:$0xff]   ;;  %v387_v15 = vld [vmem:[%s533_s1 + $0x28] sm:$0xff]  }
   0x6   :  { %v389_v16 = vld [vmem:[%s533_s1 + $0x70] sm:$0xff]   ;;  %v397_v18 = vld [vmem:[%s533_s1 + $0x98] sm:$0xff]  }
   0x7   :  { %334 = vmatpush3.bf16.msra.mxu0 %v378_v4  ;;  %v396_v17 = vld [vmem:[%s532_s0 + $0x4] ss:$12 sps:$4 sm:$0xff]  }
   0x8   :  { %335 = vmatprep.subr.bf16.mxu0 %v379_v5  ;;  %361 = vmatpush3.bf16.msra.mxu1 %v388_v11 }
   0x9   :  { %362 = vmatprep.subr.bf16.mxu1 %v423_v2  ;;  %238 = vmatprep.mubr.bf16.mxu0 %v396_v17 }
   0xb   :  { %336 = vmatpush3.bf16.msra.mxu0 %v380_v6 }
   0xc   :  { %337 = vmatprep.subr.bf16.mxu0 %v381_v7  ;;  %363 = vmatpush3.bf16.msra.mxu1 %v391_v14 }
   0xd   :  { %364 = vmatprep.subr.bf16.mxu1 %v423_v2 }
   0xf   :  { %338 = vmatpush3.bf16.msra.mxu0 %v382_v9 }
  0x10   :  { %339 = vmatprep.subr.bf16.mxu0 %v383_v10 }
  0x13   :  { %340 = vmatpush3.bf16.msra.mxu0 %v384_v12 }
  0x14   :  { %341 = vmatprep.subr.bf16.mxu0 %v386_v13 }
  0x15   :  { %8 = vsyncpa [#allocation3], 0  ;;  %v390_v19 = vld [vmem:[%s533_s1 + $0x30] sm:$0xff]   ;;  %v392_v21 = vld [vmem:[%s533_s1 + $0x78] sm:$0xff]   ;;  %365 = vmatpush3.bf16.msra.mxu1 %v397_v18  ;;  %vm202_vm1 = vcmask 523264  }
  0x16   :  { %v398_v20 = vld [vmem:[%s532_s0 + $0x8] ss:$12 sps:$4 sm:$0xff]   ;;  %v393_v22 = vld [vmem:[%s533_s1 + $0x38] sm:$0xff]   ;;  %v394_v23 = vld [vmem:[%s532_s0] ss:$12 sps:$4 sm:$0xff]   ;;  %s425_s1 = smov [#allocation2]  }
  0x17   :  { %342 = vmatpush3.bf16.msra.mxu0 %v387_v15  ;;  %v306_v30 = vld [vmem:[%s534_s2] ss:$0 sm:$0xff]  ;;  %s295_s6 = sshll.u32 %s425_s1, 4  ;;  %s296_s6 = int_to_ptr.vmem [resolvable:$true] %s295_s6 }
  0x18   :  { %343 = vmatprep.subr.bf16.mxu0 %v389_v16  ;;  %367 = vmatmul.mubr.msk.bf16.vlgmr.msra.gmra.mrb[0].mxu1 %vm202_vm1, %v398_v20  ;;  %s399_s0 = scalar_lea.vmem %s296_s6, 256  ;;  %p404_p1 = scmp.lt.s32.totalorder %s296_s6, %s296_s6 }
  0x19   :  { %p400_p0 = scmp.ne.s32.totalorder %s296_s6, %s399_s0  ;;  %p405_p2 = scmp.lt.s32.totalorder %s399_s0, %s399_s0 }
  0x1b   :  { %344 = vmatpush3.bf16.msra.mxu0 %v390_v19  ;;  %p406_p3 = por %p405_p2, %p404_p1 }
  0x1c   :  { %345 = vmatprep.subr.bf16.mxu0 %v392_v21 }
  0x1d   :  { %p407_p4 = pnand %p406_p3, %p400_p0 }
  0x1f   :  { %346 = vmatpush3.bf16.msra.mxu0 %v393_v22 }
  0x22   :  { %239 = vmatmul.mubr.bf16.vlgmr.msra.gmra.mrb[0].mxu0 %v394_v23 }
  0xeb   :  { %v281_v24 = vpop.f32.mrb[0].mxu1 }
  0xec   :  { %v368_v25 = vpop.f32.mrb[1].mxu1 }
  0xed   :  { %v284_v26 = vpop.f32.mrb[2].mxu1 }
  0xee   :  { %v369_v27 = vpop.f32.mrb[3].mxu1 }
  0xf5   :  { %v347_v28 = vpop.f32.mrb[0].mxu0 }
  0xf6   :  { %v348_v29 = vpop.f32.mrb[1].mxu0 }
  0xf7   :  { %v349_v31 = vadd.f32 %v348_v29, %v347_v28  ;;  %v350_v32 = vpop.f32.mrb[2].mxu0 }
  0xf8   :  { %v351_v33 = vpop.f32.mrb[3].mxu0 }
  0xf9   :  { %v241_v34 = vadd.f32 %v349_v31, %v306_v30  ;;  %v352_v35 = vadd.f32 %v351_v33, %v350_v32 }
  0xfb   :  { %v282_v36 = vadd.f32 %v281_v24, %v241_v34  ;;  %v244_v37 = vadd.f32 %v352_v35, %v306_v30 }
  0xfd   :  { %288 = vst [vmem:[#allocation2] sm:$0xff] %v282_v36  ;;  %v285_v38 = vadd.f32 %v284_v26, %v244_v37 }
  0xff   :  { %289 = vst [vmem:[#allocation2 + $0x8] sm:$0xff] %v285_v38 }
 0x100   :  { %410 = shalt.err (!%p407_p4)
}
 0x101   :  { %s411_s8 = scalar_lea.hbm %s535_s3, 256 }
 0x102   :  { %p412_p5 = scmp.ne.s32.totalorder %s535_s3, %s411_s8  ;;  %p415_p6 = scmp.lt.u32.totalorder %s411_s8, %s535_s3 }
 0x104   :  { %p417_p7 = pnand %p415_p6, %p412_p5 }
 0x106   :  { %420 = shalt.err (!%p417_p7)
}
 0x107   :  { %s426_s13 = smov 128   ;;  %s427_s14 = smov 8  }
 0x108   :  { %301 = dma.vmem_to_hbm [thread:$0]  %s296_s6, 256, %s535_s3, [#allocation3], %s426_s13, %s426_s13, %s427_s14  }
 0x109   :  { %421 = dma.done.wait [#allocation3], 256  }
 0x10a   :  { %422 = vsyncadd [#allocation3], 4294967040 }
 0x10b   :  { %305 = vsyncpa [#allocation3], 1 }

// kernel: _point_reducer_impl.1
= control target key start
LH: loop header
LB: loop body
LE: loop exit
PB: predicated region body
PF: predicated region fallthrough
CT: control target
= control target key end

     0   :  { %v423_v2 = vmov 0.0   ;;  %vm424_vm0 = vmmov 0   ;;  %s532_s0 = inlined_call_operand.vmem [shape: bf16[16,320], index: 0, kind: input, shape index: {}]   ;;  %s533_s1 = inlined_call_operand.vmem [shape: bf16[320,128], index: 1, kind: input, shape index: {}]   ;;  %s534_s2 = inlined_call_operand.vmem [shape: f32[1,128], index: 2, kind: input, shape index: {}]   ;;  %s535_s3 = inlined_call_operand.hbm [shape: f32[16,128], index: 3, kind: output, shape index: {}]  }
   0x1   :  { %v375_v0 = vld [vmem:[%s533_s1 + $0x40] sm:$0xff]   ;;  %358 = vmatprep.subr.bf16.mxu1 %v423_v2  ;;  %v377_v3 = vld [vmem:[%s533_s1 + $0x48] sm:$0xff]   ;;  %366 = vmatprep.mubr.msk.bf16.mxu1 %vm424_vm0, %v423_v2  ;;  %v379_v5 = vld [vmem:[%s533_s1 + $0x50] sm:$0xff]  }
   0x2   :  { %v376_v1 = vld [vmem:[%s533_s1] sm:$0xff]   ;;  %331 = vmatprep.subr.bf16.mxu0 %v375_v0  ;;  %v378_v4 = vld [vmem:[%s533_s1 + $0x8] sm:$0xff]   ;;  %v380_v6 = vld [vmem:[%s533_s1 + $0x10] sm:$0xff]  }
   0x3   :  { %332 = vmatpush3.bf16.msra.mxu0 %v376_v1  ;;  %v381_v7 = vld [vmem:[%s533_s1 + $0x58] sm:$0xff]   ;;  %v385_v8 = vld [vmem:[%s533_s1 + $0x80] sm:$0xff]   ;;  %v388_v11 = vld [vmem:[%s533_s1 + $0x88] sm:$0xff]  }
   0x4   :  { %333 = vmatprep.subr.bf16.mxu0 %v377_v3  ;;  %v382_v9 = vld [vmem:[%s533_s1 + $0x18] sm:$0xff]   ;;  %v383_v10 = vld [vmem:[%s533_s1 + $0x60] sm:$0xff]   ;;  %359 = vmatpush3.bf16.msra.mxu1 %v385_v8  ;;  %v386_v13 = vld [vmem:[%s533_s1 + $0x68] sm:$0xff]  }
   0x5   :  { %360 = vmatprep.subr.bf16.mxu1 %v423_v2  ;;  %v384_v12 = vld [vmem:[%s533_s1 + $0x20] sm:$0xff]   ;;  %v391_v14 = vld [vmem:[%s533_s1 + $0x90] sm:$0xff]   ;;  %v387_v15 = vld [vmem:[%s533_s1 + $0x28] sm:$0xff]  }
   0x6   :  { %v389_v16 = vld [vmem:[%s533_s1 + $0x70] sm:$0xff]   ;;  %v397_v18 = vld [vmem:[%s533_s1 + $0x98] sm:$0xff]  }
   0x7   :  { %334 = vmatpush3.bf16.msra.mxu0 %v378_v4  ;;  %v396_v17 = vld [vmem:[%s532_s0 + $0x4] ss:$12 sps:$4 sm:$0xff]  }
   0x8   :  { %335 = vmatprep.subr.bf16.mxu0 %v379_v5  ;;  %361 = vmatpush3.bf16.msra.mxu1 %v388_v11 }
   0x9   :  { %362 = vmatprep.subr.bf16.mxu1 %v423_v2  ;;  %238 = vmatprep.mubr.bf16.mxu0 %v396_v17 }
   0xb   :  { %336 = vmatpush3.bf16.msra.mxu0 %v380_v6 }
   0xc   :  { %337 = vmatprep.subr.bf16.mxu0 %v381_v7  ;;  %363 = vmatpush3.bf16.msra.mxu1 %v391_v14 }
   0xd   :  { %364 = vmatprep.subr.bf16.mxu1 %v423_v2 }
   0xf   :  { %338 = vmatpush3.bf16.msra.mxu0 %v382_v9 }
  0x10   :  { %339 = vmatprep.subr.bf16.mxu0 %v383_v10 }
  0x13   :  { %340 = vmatpush3.bf16.msra.mxu0 %v384_v12 }
  0x14   :  { %341 = vmatprep.subr.bf16.mxu0 %v386_v13 }
  0x15   :  { %8 = vsyncpa [#allocation3], 0  ;;  %v390_v19 = vld [vmem:[%s533_s1 + $0x30] sm:$0xff]   ;;  %v392_v21 = vld [vmem:[%s533_s1 + $0x78] sm:$0xff]   ;;  %365 = vmatpush3.bf16.msra.mxu1 %v397_v18  ;;  %vm202_vm1 = vcmask 523264  }
  0x16   :  { %v398_v20 = vld [vmem:[%s532_s0 + $0x8] ss:$12 sps:$4 sm:$0xff]   ;;  %v393_v22 = vld [vmem:[%s533_s1 + $0x38] sm:$0xff]   ;;  %v394_v23 = vld [vmem:[%s532_s0] ss:$12 sps:$4 sm:$0xff]   ;;  %s425_s1 = smov [#allocation2]  }
  0x17   :  { %342 = vmatpush3.bf16.msra.mxu0 %v387_v15  ;;  %v306_v30 = vld [vmem:[%s534_s2] ss:$0 sm:$0xff]  ;;  %s295_s6 = sshll.u32 %s425_s1, 4  ;;  %s296_s6 = int_to_ptr.vmem [resolvable:$true] %s295_s6 }
  0x18   :  { %343 = vmatprep.subr.bf16.mxu0 %v389_v16  ;;  %367 = vmatmul.mubr.msk.bf16.vlgmr.msra.gmra.mrb[0].mxu1 %vm202_vm1, %v398_v20  ;;  %s399_s0 = scalar_lea.vmem %s296_s6, 256  ;;  %p404_p1 = scmp.lt.s32.totalorder %s296_s6, %s296_s6 }
  0x19   :  { %p400_p0 = scmp.ne.s32.totalorder %s296_s6, %s399_s0  ;;  %p405_p2 = scmp.lt.s32.totalorder %s399_s0, %s399_s0 }
  0x1b   :  { %344 = vmatpush3.bf16.msra.mxu0 %v390_v19  ;;  %p406_p3 = por %p405_p2, %p404_p1 }
  0x1c   :  { %345 = vmatprep.subr.bf16.mxu0 %v392_v21 }
  0x1d   :  { %p407_p4 = pnand %p406_p3, %p400_p0 }
  0x1f   :  { %346 = vmatpush3.bf16.msra.mxu0 %v393_v22 }
  0x22   :  { %239 = vmatmul.mubr.bf16.vlgmr.msra.gmra.mrb[0].mxu0 %v394_v23 }
  0xeb   :  { %v281_v24 = vpop.f32.mrb[0].mxu1 }
  0xec   :  { %v368_v25 = vpop.f32.mrb[1].mxu1 }
  0xed   :  { %v284_v26 = vpop.f32.mrb[2].mxu1 }
  0xee   :  { %v369_v27 = vpop.f32.mrb[3].mxu1 }
  0xf5   :  { %v347_v28 = vpop.f32.mrb[0].mxu0 }
  0xf6   :  { %v348_v29 = vpop.f32.mrb[1].mxu0 }
  0xf7   :  { %v349_v31 = vadd.f32 %v348_v29, %v347_v28  ;;  %v350_v32 = vpop.f32.mrb[2].mxu0 }
  0xf8   :  { %v351_v33 = vpop.f32.mrb[3].mxu0 }
  0xf9   :  { %v241_v34 = vadd.f32 %v349_v31, %v306_v30  ;;  %v352_v35 = vadd.f32 %v351_v33, %v350_v32 }
  0xfb   :  { %v282_v36 = vadd.f32 %v281_v24, %v241_v34  ;;  %v244_v37 = vadd.f32 %v352_v35, %v306_v30 }
  0xfd   :  { %288 = vst [vmem:[#allocation2] sm:$0xff] %v282_v36  ;;  %v285_v38 = vadd.f32 %v284_v26, %v244_v37 }
  0xff   :  { %289 = vst [vmem:[#allocation2 + $0x8] sm:$0xff] %v285_v38 }
 0x100   :  { %410 = shalt.err (!%p407_p4)
}
 0x101   :  { %s411_s8 = scalar_lea.hbm %s535_s3, 256 }
 0x102   :  { %p412_p5 = scmp.ne.s32.totalorder %s535_s3, %s411_s8  ;;  %p415_p6 = scmp.lt.u32.totalorder %s411_s8, %s535_s3 }
 0x104   :  { %p417_p7 = pnand %p415_p6, %p412_p5 }
 0x106   :  { %420 = shalt.err (!%p417_p7)
}
 0x107   :  { %s426_s13 = smov 128   ;;  %s427_s14 = smov 8  }
 0x108   :  { %301 = dma.vmem_to_hbm [thread:$0]  %s296_s6, 256, %s535_s3, [#allocation3], %s426_s13, %s426_s13, %s427_s14  }
 0x109   :  { %421 = dma.done.wait [#allocation3], 256  }
 0x10a   :  { %422 = vsyncadd [#allocation3], 4294967040 }
 0x10b   :  { %305 = vsyncpa [#allocation3], 1 }

</bundles_post_ra>
